<compile_context>
chip_gen: v6e
topology: v6e:2x2x1
jax: 0.10.0
libtpu: 0.0.40
codegen_flags: <defaults>
</compile_context>

<pallas_src>
import functools

import jax
import jax.numpy as jnp
from jax import lax
from jax.experimental import pallas as pl
from jax.experimental.pallas import tpu as pltpu

EPS = 1e-5
_SUBLANE = 8


def _round_up(x, m):
    return (x + m - 1) // m * m


# --------------------------- chip-aware knobs ------------------------------ #

@functools.lru_cache(maxsize=None)
def _chip():
    """Return (two_tensorcores_per_chip, vmem_limit_bytes), inferred from VMEM."""
    try:
        cap = int(pltpu.get_tpu_info().vmem_capacity_bytes)
    except Exception:
        cap = 64 * 1024 * 1024  # conservative default (v7x-like)
    if cap <= 64 * 1024 * 1024:
        # v7x: 64 MiB VMEM per TC, 2 TCs share HBM -> stay under 48 MiB scoped.
        return True, 48 * 1024 * 1024
    # v5e / v6e: 128 MiB VMEM, single TensorCore.
    return False, 96 * 1024 * 1024


def _choose_block_rows(n_rows, d, itemsize, two_cores):
    """Row tile for the standalone LayerNorm pass (pure HBM roofline)."""
    row_bytes = max(1, d * itemsize)
    # ~8 MiB tiles: double-buffered in+out footprint ~= 4x tile ~= 32 MiB,
    # safely under the 48 MiB limit used on 64-MiB-VMEM chips.
    br = max(_SUBLANE, (8 * 1024 * 1024 // row_bytes) // _SUBLANE * _SUBLANE)
    br = min(br, _round_up(n_rows, _SUBLANE))
    if two_cores:
        # 2 TensorCores: ask for >=2 (ideally even) grid steps, but only if
        # each tile stays >= ~2 MiB or >= 512 rows; otherwise keep one big step.
        half = max(_SUBLANE, _round_up(-(-n_rows // 2), _SUBLANE))
        if half * row_bytes >= 2 * 1024 * 1024 or half >= 512:
            br = min(br, half)
        steps = -(-n_rows // br)
        if steps > 1 and steps % 2 == 1:
            br = max(_SUBLANE, _round_up(-(-n_rows // (steps + 1)), _SUBLANE))
    return int(br)


def _choose_mm_tiles(m, k, n, itemsize):
    """Row/col tiles for the (LN+)matmul kernel; K is kept whole per block."""
    tn = n if n <= 2048 else 1024  # lane-dense; ragged last N block is masked
    # Keep the double-buffered (x + w + out) footprint around ~32 MiB.
    budget = 16 * 1024 * 1024
    rem = max(budget - k * tn * itemsize, 4 * 1024 * 1024)
    tm = rem // max(1, (k + tn) * itemsize)
    if m <= tm:
        tm = m                                             # full extent (legal)
    else:
        tm = max(_SUBLANE, min(int(tm), 4096) // _SUBLANE * _SUBLANE)
    return int(tm), int(tn)


# ----------------------------- kernel bodies ------------------------------- #

def _make_ln_kernel(*, has_bias, inv_d):
    def kernel(*refs):
        if has_bias:
            x_ref, w_ref, b_ref, o_ref = refs
        else:
            x_ref, w_ref, o_ref = refs
            b_ref = None
        x = x_ref[...].astype(jnp.float32)                 # (br, D)
        mean = jnp.sum(x, axis=-1, keepdims=True) * jnp.float32(inv_d)
        c = x - mean
        var = jnp.sum(c * c, axis=-1, keepdims=True) * jnp.float32(inv_d)
        y = c * lax.rsqrt(var + jnp.float32(EPS)) * w_ref[...].astype(jnp.float32)
        if has_bias:
            y = y + b_ref[...].astype(jnp.float32)
        o_ref[...] = y.astype(o_ref.dtype)
    return kernel


def _make_linear_kernel(*, has_ln, has_ln_bias, has_bias, inv_k):
    """y = (optional LayerNorm(x)) @ W (+ b), computed on one (tm, tn) tile."""
    def kernel(*refs):
        it = iter(refs)
        x_ref = next(it)
        lnw_ref = next(it) if has_ln else None
        lnb_ref = next(it) if has_ln_bias else None
        w_ref = next(it)
        b_ref = next(it) if has_bias else None
        o_ref = next(it)

        x = x_ref[...].astype(jnp.float32)                 # (tm, K)
        if has_ln:
            mean = jnp.sum(x, axis=-1, keepdims=True) * jnp.float32(inv_k)
            c = x - mean
            var = jnp.sum(c * c, axis=-1, keepdims=True) * jnp.float32(inv_k)
            x = c * lax.rsqrt(var + jnp.float32(EPS)) * lnw_ref[...].astype(jnp.float32)
            if has_ln_bias:
                x = x + lnb_ref[...].astype(jnp.float32)
        y = jnp.dot(x.astype(w_ref.dtype), w_ref[...],
                    preferred_element_type=jnp.float32)    # MXU
        if has_bias:
            y = y + b_ref[...].astype(jnp.float32)
        o_ref[...] = y.astype(o_ref.dtype)
    return kernel


# -------------------------------- wrappers ---------------------------------- #

def layer_norm(x, weight, bias=None, *, block_rows=None):
    """Standalone LayerNorm over the last axis (F.layer_norm, eps=1e-5)."""
    D = weight.shape[0]
    assert x.shape[-1] == D, "feature dim mismatch"
    orig_shape = x.shape
    x2 = x.reshape(-1, D)
    M = x2.shape[0]
    itemsize = jnp.dtype(x.dtype).itemsize
    two_cores, vmem_limit = _chip()
    if block_rows is None:
        br = _choose_block_rows(M, D, itemsize, two_cores)
    else:
        br = _round_up(int(block_rows), _SUBLANE)

    kernel = _make_ln_kernel(has_bias=bias is not None, inv_d=1.0 / D)
    in_specs = [pl.BlockSpec((br, D), lambda i: (i, 0)),
                pl.BlockSpec((1, D), lambda i: (0, 0))]
    args = [x2, weight.reshape(1, D)]
    if bias is not None:
        in_specs.append(pl.BlockSpec((1, D), lambda i: (0, 0)))
        args.append(bias.reshape(1, D))

    out = pl.pallas_call(
        kernel,
        out_shape=jax.ShapeDtypeStruct((M, D), x.dtype),
        grid=(pl.cdiv(M, br),),                             # ragged last block OK
        in_specs=in_specs,
        out_specs=pl.BlockSpec((br, D), lambda i: (i, 0)),
        compiler_params=pltpu.CompilerParams(
            dimension_semantics=("parallel",),
            vmem_limit_bytes=vmem_limit,
        ),
    )(*args)
    return out.reshape(orig_shape)


def fused_linear(x, w, b=None, *, ln_weight=None, ln_bias=None):
    """y = (optional LayerNorm(x)) @ w (+ b); w has shape (K, N)."""
    K, N = w.shape
    assert x.shape[-1] == K, "contracting dim mismatch"
    assert ln_weight is not None or ln_bias is None
    orig_shape = x.shape
    x2 = x.reshape(-1, K)
    M = x2.shape[0]
    itemsize = jnp.dtype(x.dtype).itemsize
    two_cores, vmem_limit = _chip()
    tm, tn = _choose_mm_tiles(M, K, N, itemsize)

    in_specs = [pl.BlockSpec((tm, K), lambda i, j: (i, 0))]
    args = [x2]
    if ln_weight is not None:
        in_specs.append(pl.BlockSpec((1, K), lambda i, j: (0, 0)))
        args.append(ln_weight.reshape(1, K))
        if ln_bias is not None:
            in_specs.append(pl.BlockSpec((1, K), lambda i, j: (0, 0)))
            args.append(ln_bias.reshape(1, K))
    in_specs.append(pl.BlockSpec((K, tn), lambda i, j: (0, j)))
    args.append(w)
    if b is not None:
        in_specs.append(pl.BlockSpec((1, tn), lambda i, j: (0, j)))
        args.append(b.reshape(1, N))

    kernel = _make_linear_kernel(has_ln=ln_weight is not None,
                                 has_ln_bias=ln_bias is not None,
                                 has_bias=b is not None,
                                 inv_k=1.0 / K)
    out = pl.pallas_call(
        kernel,
        out_shape=jax.ShapeDtypeStruct((M, N), x.dtype),
        grid=(pl.cdiv(M, tm), pl.cdiv(N, tn)),              # ragged blocks OK
        in_specs=in_specs,
        out_specs=pl.BlockSpec((tm, tn), lambda i, j: (i, j)),
        compiler_params=pltpu.CompilerParams(
            dimension_semantics=("parallel", "parallel"),
            vmem_limit_bytes=vmem_limit,
        ),
    )(*args)
    return out.reshape(orig_shape[:-1] + (N,))


# --------------------------------- demo ------------------------------------- #

def _ref_ln(x, w, b=None):
    m = jnp.mean(x, axis=-1, keepdims=True)
    v = jnp.mean((x - m) ** 2, axis=-1, keepdims=True)
    y = (x - m) / jnp.sqrt(v + EPS) * w
    return y + b if b is not None else y


if __name__ == "__main__":
    key = jax.random.PRNGKey(0)
    ks = jax.random.split(key, 10)

    # 1) Standalone LayerNorm, small shapes (D=32: non-128-lane feature dim ->
    #    kernel-side masked stores; no wrapper pad or output slice anymore).
    B, T, D = 2, 8, 32
    x_small = jax.random.normal(ks[0], (B, T, D), jnp.float32)
    w_small = 1.0 + 0.1 * jax.random.normal(ks[1], (D,), jnp.float32)
    b_small = 0.1 * jax.random.normal(ks[2], (D,), jnp.float32)

    y1 = layer_norm(x_small, w_small, b_small)
    jax.block_until_ready(y1)
    assert jnp.allclose(y1, _ref_ln(x_small, w_small, b_small), atol=1e-5, rtol=1e-5)

    y2 = layer_norm(x_small, w_small, None)                 # GPTConfig bias=False
    assert jnp.allclose(y2, _ref_ln(x_small, w_small, None), atol=1e-5, rtol=1e-5)

    x_odd = jax.random.normal(ks[3], (3, 7, D), jnp.float32)  # 21 rows: ragged last block
    y3 = layer_norm(x_odd, w_small, None, block_rows=8)
    assert jnp.allclose(y3, _ref_ln(x_odd, w_small, None), atol=1e-5, rtol=1e-5)

    # 2) Fused LN + QKV projection at the GPT hidden size (lane-dense path,
    #    row count deliberately not a multiple of the row tile).
    n_embd = 768
    rows = 200
    xg = 0.02 * jax.random.normal(ks[4], (rows, n_embd), jnp.float32)
    lnw = 1.0 + 0.05 * jax.random.normal(ks[5], (n_embd,), jnp.float32)
    w_qkv = 0.02 * jax.random.normal(ks[6], (n_embd, 3 * n_embd), jnp.float32)
    yf = fused_linear(xg, w_qkv, ln_weight=lnw)
    jax.block_until_ready(yf)
    ref_f = _ref_ln(xg, lnw, None) @ w_qkv
    assert jnp.allclose(yf, ref_f, atol=1e-2, rtol=1e-2)

    # 3) Small end-to-end GPT forward (n_layer=1, bias=False) built on the kernels.
    n_head, n_embd_s, vocab, block_size = 4, 64, 10, 16
    Bt, Tt = 2, 8
    kk = jax.random.split(ks[7], 8)

    def nrm(k, shape):
        return 0.02 * jax.random.normal(k, shape, jnp.float32)

    p = dict(
        wte=nrm(kk[0], (vocab, n_embd_s)),
        wpe=nrm(kk[1], (block_size, n_embd_s)),
        ln1_w=jnp.ones((n_embd_s,), jnp.float32),
        w_attn=nrm(kk[2], (n_embd_s, 3 * n_embd_s)),
        w_aproj=nrm(kk[3], (n_embd_s, n_embd_s)),
        ln2_w=jnp.ones((n_embd_s,), jnp.float32),
        w_fc=nrm(kk[4], (n_embd_s, 4 * n_embd_s)),
        w_mproj=nrm(kk[5], (4 * n_embd_s, n_embd_s)),
        lnf_w=jnp.ones((n_embd_s,), jnp.float32),
    )
    idx = jax.random.randint(ks[8], (Bt, Tt), 0, vocab)

    def attn_core(q, k, v):
        b, t, c = q.shape
        hd = c // n_head
        def split(z):
            return z.reshape(b, t, n_head, hd).transpose(0, 2, 1, 3)
        q, k, v = split(q), split(k), split(v)
        att = jnp.einsum("bhqd,bhkd->bhqk", q, k) / jnp.sqrt(jnp.float32(hd))
        mask = jnp.tril(jnp.ones((t, t), dtype=bool))
        att = jnp.where(mask[None, None], att, -jnp.inf)
        att = jax.nn.softmax(att, axis=-1)
        y = jnp.einsum("bhqk,bhkd->bhqd", att, v)
        return y.transpose(0, 2, 1, 3).reshape(b, t, c)

    def gpt_forward_pallas(idx):
        b, t = idx.shape
        # TODO(synk): embedding-table gather as a Pallas kernel.
        x = jnp.take(p["wte"], idx, axis=0) + p["wpe"][:t][None]
        qkv = fused_linear(x, p["w_attn"], ln_weight=p["ln1_w"])     # ln_1 fused into c_attn
        q, k, v = jnp.split(qkv, 3, axis=-1)
        y = attn_core(q, k, v)  # TODO(synk): causal flash-attention Pallas kernel.
        x = x + fused_linear(y, p["w_aproj"])
        h = fused_linear(x, p["w_fc"], ln_weight=p["ln2_w"])          # ln_2 fused into c_fc
        h = jax.nn.gelu(h, approximate=False)  # TODO(synk): fuse exact-erf GELU epilogue into c_fc kernel.
        x = x + fused_linear(h, p["w_mproj"])
        # ln_f fused into the (weight-tied) lm_head, last token only (inference path).
        return fused_linear(x[:, -1:, :], p["wte"].T, ln_weight=p["lnf_w"])

    def gpt_forward_ref(idx):
        b, t = idx.shape
        x = jnp.take(p["wte"], idx, axis=0) + p["wpe"][:t][None]
        qkv = _ref_ln(x, p["ln1_w"]) @ p["w_attn"]
        q, k, v = jnp.split(qkv, 3, axis=-1)
        x = x + attn_core(q, k, v) @ p["w_aproj"]
        h = jax.nn.gelu(_ref_ln(x, p["ln2_w"]) @ p["w_fc"], approximate=False)
        x = x + h @ p["w_mproj"]
        return _ref_ln(x[:, -1:, :], p["lnf_w"]) @ p["wte"].T

    logits = jax.jit(gpt_forward_pallas)(idx)
    jax.block_until_ready(logits)
    logits_ref = gpt_forward_ref(idx)
    assert logits.shape == (Bt, 1, vocab)
    assert jnp.allclose(logits, logits_ref, atol=1e-2, rtol=1e-2), \
        "GPT forward mismatch vs reference"

    print("KERNEL_OK")
</pallas_src>

<mosaic_0001>
module attributes {stable_mosaic.version = 11 : i64} {
  func.func @kernel(%arg0: i32, %arg1: memref<16x32xf32, #tpu.memory_space<vmem>>, %arg2: memref<1x32xf32, #tpu.memory_space<vmem>>, %arg3: memref<1x32xf32, #tpu.memory_space<vmem>>, %arg4: memref<16x32xf32, #tpu.memory_space<vmem>>) attributes {dimension_semantics = [#tpu.dimension_semantics<parallel>], iteration_bounds = array<i64: 1>, scalar_prefetch = 0 : i64, scratch_operands = 0 : i64, tpu.core_type = #tpu.core_type<tc>, window_params = [{transform_indices = @transform_0, window_bounds = array<i64: 16, 32>}, {pipeline_mode = #tpu.pipeline_mode<synchronous>, transform_indices = @transform_1, window_bounds = array<i64: 1, 32>}, {pipeline_mode = #tpu.pipeline_mode<synchronous>, transform_indices = @transform_2, window_bounds = array<i64: 1, 32>}, {transform_indices = @transform_3, window_bounds = array<i64: 16, 32>}]} {
    %c0 = arith.constant 0 : index
    %c0_0 = arith.constant 0 : index
    %0 = vector.load %arg1[%c0, %c0_0] : memref<16x32xf32, #tpu.memory_space<vmem>>, vector<16x32xf32>
    %cst = arith.constant dense<0.000000e+00> : vector<16xf32>
    %1 = vector.multi_reduction <add>, %0, %cst [1] : vector<16x32xf32> to vector<16xf32>
    %2 = vector.shape_cast %1 : vector<16xf32> to vector<16x1xf32>
    %cst_1 = arith.constant 3.125000e-02 : f32
    %3 = vector.broadcast %cst_1 : f32 to vector<16x1xf32>
    %4 = arith.mulf %2, %3 : vector<16x1xf32>
    %5 = vector.broadcast %4 : vector<16x1xf32> to vector<16x32xf32>
    %6 = arith.subf %0, %5 : vector<16x32xf32>
    %7 = arith.mulf %6, %6 : vector<16x32xf32>
    %cst_2 = arith.constant dense<0.000000e+00> : vector<16xf32>
    %8 = vector.multi_reduction <add>, %7, %cst_2 [1] : vector<16x32xf32> to vector<16xf32>
    %9 = vector.shape_cast %8 : vector<16xf32> to vector<16x1xf32>
    %cst_3 = arith.constant 3.125000e-02 : f32
    %10 = vector.broadcast %cst_3 : f32 to vector<16x1xf32>
    %11 = arith.mulf %9, %10 : vector<16x1xf32>
    %cst_4 = arith.constant 9.99999974E-6 : f32
    %12 = vector.broadcast %cst_4 : f32 to vector<16x1xf32>
    %13 = arith.addf %11, %12 : vector<16x1xf32>
    %14 = math.rsqrt %13 : vector<16x1xf32>
    %15 = vector.broadcast %14 : vector<16x1xf32> to vector<16x32xf32>
    %16 = arith.mulf %6, %15 : vector<16x32xf32>
    %c0_5 = arith.constant 0 : index
    %c0_6 = arith.constant 0 : index
    %17 = vector.load %arg2[%c0_5, %c0_6] : memref<1x32xf32, #tpu.memory_space<vmem>>, vector<1x32xf32>
    %18 = vector.broadcast %17 : vector<1x32xf32> to vector<16x32xf32>
    %19 = arith.mulf %16, %18 : vector<16x32xf32>
    %c0_7 = arith.constant 0 : index
    %c0_8 = arith.constant 0 : index
    %20 = vector.load %arg3[%c0_7, %c0_8] : memref<1x32xf32, #tpu.memory_space<vmem>>, vector<1x32xf32>
    %21 = vector.broadcast %20 : vector<1x32xf32> to vector<16x32xf32>
    %22 = arith.addf %19, %21 : vector<16x32xf32>
    %c0_9 = arith.constant 0 : index
    %c0_10 = arith.constant 0 : index
    %23 = vector.load %arg4[%c0_9, %c0_10] : memref<16x32xf32, #tpu.memory_space<vmem>>, vector<16x32xf32>
    tpu.vector_store %arg4[%c0_9, %c0_10], %22 {strides = array<i32>} : memref<16x32xf32, #tpu.memory_space<vmem>>, vector<16x32xf32>,
    return
  }
  func.func @transform_0(%arg0: i32) -> (i32, i32) {
    %c0_i32 = arith.constant 0 : i32
    %c0_i32_0 = arith.constant 0 : i32
    return %arg0, %c0_i32 : i32, i32
  }
  func.func @transform_1(%arg0: i32) -> (i32, i32) {
    %c0_i32 = arith.constant 0 : i32
    %c0_i32_0 = arith.constant 0 : i32
    %c0_i32_1 = arith.constant 0 : i32
    return %c0_i32, %c0_i32_0 : i32, i32
  }
  func.func @transform_2(%arg0: i32) -> (i32, i32) {
    %c0_i32 = arith.constant 0 : i32
    %c0_i32_0 = arith.constant 0 : i32
    %c0_i32_1 = arith.constant 0 : i32
    return %c0_i32, %c0_i32_0 : i32, i32
  }
  func.func @transform_3(%arg0: i32) -> (i32, i32) {
    %c0_i32 = arith.constant 0 : i32
    %c0_i32_0 = arith.constant 0 : i32
    return %arg0, %c0_i32 : i32, i32
  }
}

</mosaic_0001>

<bundles_post_ra>
// kernel: tpu_custom_call.1
= control target key start
LH: loop header
LB: loop body
LE: loop exit
PB: predicated region body
PF: predicated region fallthrough
CT: control target
= control target key end

     0   :  { %8 = vsyncpa [#allocation3], 0  ;;  %s197_s0 = inlined_call_operand.hbm [shape: f32[16,32], index: 0, kind: input, shape index: {}]   ;;  %s198_s1 = inlined_call_operand.vmem [shape: f32[1,32], index: 1, kind: input, shape index: {}]   ;;  %s199_s2 = inlined_call_operand.vmem [shape: f32[1,32], index: 2, kind: input, shape index: {}]   ;;  %s200_s3 = inlined_call_operand.hbm [shape: f32[16,32], index: 3, kind: output, shape index: {}]  }
   0x1   :  { %9 = vsyncpa [#allocation4], 0  ;;  %s149_s12 = smov [#allocation2]  }
   0x2   :  { %s15_s13 = sshll.u32 %s149_s12, 4  ;;  %s16_s13 = int_to_ptr.vmem [resolvable:$true] %s15_s13 }
   0x3   :  { %s113_s14 = scalar_lea.vmem %s16_s13, 256  ;;  %p118_p1 = scmp.lt.s32.totalorder %s16_s13, %s16_s13 }
   0x4   :  { %p114_p0 = scmp.ne.s32.totalorder %s16_s13, %s113_s14  ;;  %p119_p2 = scmp.lt.s32.totalorder %s113_s14, %s113_s14 }
   0x6   :  { %p120_p3 = por %p119_p2, %p118_p1 }
   0x8   :  { %p121_p4 = pnand %p120_p3, %p114_p0 }
   0xa   :  { %124 = shalt.err (!%p121_p4)
}
   0xb   :  { %s150_s15 = smov 128   ;;  %s151_s16 = smov 8  }
   0xc   :  { %21 = dma.hbm_to_vmem [thread:$0]  %s197_s0, 256, %s16_s13, [#allocation3], %s150_s15, %s150_s15, %s151_s16  }
   0xd   :  { %145 = dma.done.wait [#allocation3], 256  }
   0xe   :  { %146 = vsyncadd [#allocation3], 4294967040  ;;  %vm31_vm0 = vcmask 261120   ;;  %v29_v0 = vld [vmem:[#allocation2] sm:$0xff]  ;;  %v30_v1 = vld [vmem:[#allocation2 + $0x8] sm:$0xff]  ;;  %s152_s22 = smov [#allocation5]  }
   0xf   :  { %v32_v2 = vsel %vm31_vm0, %v29_v0, 0.0  ;;  %v35_v3 = vsel %vm31_vm0, %v30_v1, 0.0  ;;  %v95_v21 = vld [vmem:[%s198_s1] ss:$0 sm:$0xff]  ;;  %s83_s23 = sshll.u32 %s152_s22, 4  ;;  %s84_s23 = int_to_ptr.vmem [resolvable:$true] %s83_s23 }
  0x10   :  { %33 = vadd.xlane.f32.xlu0 %v32_v2  ;;  %v96_v23 = vld [vmem:[%s199_s2] ss:$0 sm:$0xff]  ;;  %s125_s24 = scalar_lea.vmem %s84_s23, 256  ;;  %p130_p6 = scmp.lt.s32.totalorder %s84_s23, %s84_s23 }
  0x11   :  { %p126_p5 = scmp.ne.s32.totalorder %s84_s23, %s125_s24  ;;  %p131_p7 = scmp.lt.s32.totalorder %s125_s24, %s125_s24 }
  0x13   :  { %p132_p8 = por %p131_p7, %p130_p6 }
  0x14   :  { %36 = vadd.xlane.f32.xlu0 %v35_v3 }
  0x15   :  { %p133_p9 = pnand %p132_p8, %p126_p5 }
  0x99   :  { %v34_v4 = vpop.xlane.xlu0 %33 }
  0x9a   :  { %v38_v5 = vmul.f32 0.03125, %v34_v4 }
  0x9c   :  { %v40_v6 = vsub.f32 %v29_v0, %v38_v5 }
  0x9d   :  { %v37_v7 = vpop.xlane.xlu0 %36 }
  0x9e   :  { %v39_v8 = vmul.f32 0.03125, %v37_v7  ;;  %v42_v9 = vmul.f32 %v40_v6, %v40_v6 }
  0xa0   :  { %v41_v10 = vsub.f32 %v30_v1, %v39_v8  ;;  %v44_v11 = vsel %vm31_vm0, %v42_v9, 0.0 }
  0xa1   :  { %45 = vadd.xlane.f32.xlu1 %v44_v11 }
  0xa2   :  { %v43_v12 = vmul.f32 %v41_v10, %v41_v10 }
  0xa4   :  { %v47_v13 = vsel %vm31_vm0, %v43_v12, 0.0 }
  0xa5   :  { %48 = vadd.xlane.f32.xlu1 %v47_v13 }
 0x12a   :  { %v46_v14 = vpop.xlane.xlu1 %45 }
 0x12b   :  { %v50_v15 = vmul.f32 0.03125, %v46_v14 }
 0x12d   :  { %v52_v16 = vadd.f32 1e-05, %v50_v15 }
 0x12e   :  { %v49_v17 = vpop.xlane.xlu1 %48 }
 0x12f   :  { %101 = vrsqrt.f32 %v52_v16  ;;  %v51_v18 = vmul.f32 0.03125, %v49_v17 }
 0x131   :  { %v53_v19 = vadd.f32 1e-05, %v51_v18 }
 0x133   :  { %103 = vrsqrt.f32 %v53_v19 }
 0x13c   :  { %v102_v20 = vpop.eup %101 }
 0x13d   :  { %v56_v22 = vmul.f32 %v102_v20, %v40_v6 }
 0x13f   :  { %v65_v24 = vmul.f32 %v95_v21, %v56_v22 }
 0x140   :  { %v104_v25 = vpop.eup %103 }
 0x141   :  { %v57_v26 = vmul.f32 %v104_v25, %v41_v10  ;;  %v74_v27 = vadd.f32 %v96_v23, %v65_v24 }
 0x143   :  { %v66_v28 = vmul.f32 %v95_v21, %v57_v26  ;;  %76 = vst.msk [vmem:[#allocation5] sm:$0xff] %vm31_vm0, %v74_v27 }
 0x145   :  { %v75_v29 = vadd.f32 %v96_v23, %v66_v28 }
 0x147   :  { %77 = vst.msk [vmem:[#allocation5 + $0x8] sm:$0xff] %vm31_vm0, %v75_v29 }
 0x148   :  { %136 = shalt.err (!%p133_p9)
}
 0x149   :  { %89 = dma.vmem_to_hbm [thread:$0]  %s84_s23, 256, %s200_s3, [#allocation4], %s150_s15, %s150_s15, %s151_s16  }
 0x14a   :  { %147 = dma.done.wait [#allocation4], 256  }
 0x14b   :  { %148 = vsyncadd [#allocation4], 4294967040 }
 0x14c   :  { %93 = vsyncpa [#allocation3], 1 }
 0x14d   :  { %94 = vsyncpa [#allocation4], 1 }

</bundles_post_ra>
